<compile_context>
chip_gen: v7x
topology: tpu7x:2x2x1
jax: 0.10.0
libtpu: 0.0.40
codegen_flags: <defaults>
</compile_context>

<pallas_src>
import functools

import jax
import jax.numpy as jnp
from jax.experimental import pallas as pl
from jax.experimental.pallas import tpu as pltpu


def _mlp_kernel(x_ref, w1_ref, b1_ref, w2_ref, b2_ref, w3_ref, b3_ref, o_ref):
    # Fused hot path: 3 matmuls (MXU, bf16 inputs, f32 accumulation) + 2 ReLUs (VPU, f32).
    x = x_ref[...]  # (bt, in_dim) bf16
    h = jnp.dot(x, w1_ref[...], preferred_element_type=jnp.float32) + b1_ref[...]
    h = jnp.maximum(h, 0.0)  # f32 elementwise (cheap path on v5e/v6e/v7x)
    h = jnp.dot(h.astype(jnp.bfloat16), w2_ref[...],
                preferred_element_type=jnp.float32) + b2_ref[...]
    h = jnp.maximum(h, 0.0)
    y = jnp.dot(h.astype(jnp.bfloat16), w3_ref[...],
                preferred_element_type=jnp.float32) + b3_ref[...]
    o_ref[...] = y.astype(o_ref.dtype)  # (bt, n_pad) lane-dense (128-wide) store


def _round_up(x, m):
    return ((x + m - 1) // m) * m


@functools.partial(jax.jit, static_argnames=("batch_tile",))
def mlp_forward(x, params, *, batch_tile=256):
    """x: (B, in_dim) f32. params: dict of (w1,b1,w2,b2,w3,b3), weights as (in, out)."""
    w1, b1 = params["w1"], params["b1"]
    w2, b2 = params["w2"], params["b2"]
    w3, b3 = params["w3"], params["b3"]

    B, in_dim = x.shape
    h1 = w1.shape[1]
    h2 = w2.shape[1]
    out_dim = w3.shape[1]

    # ---- wrapper-side layout prep (plain JAX glue) -------------------------
    # bf16 streaming inputs / resident weights; biases stay f32 (added post-accum).
    x_bf = x.astype(jnp.bfloat16)
    w1_bf = w1.astype(jnp.bfloat16)
    w2_bf = w2.astype(jnp.bfloat16)
    w3_bf = w3.astype(jnp.bfloat16)

    # Lane-dense output: pad last layer's output columns up to a multiple of 128.
    n_pad = _round_up(max(out_dim, 128), 128)
    if n_pad != out_dim:
        w3_bf = jnp.pad(w3_bf, ((0, 0), (0, n_pad - out_dim)))
        b3 = jnp.pad(b3, ((0, 0), (0, n_pad - out_dim)))

    # Batch tile: large by default, multiple of 8, clamped so tiny demo batches
    # don't get blown up; cap at 256 to keep chained f32 intermediates off the spill path.
    bt = max(8, min(_round_up(batch_tile, 8), 256))
    bt = min(bt, _round_up(B, 8))

    Bp = _round_up(B, bt)
    if Bp != B:
        x_bf = jnp.pad(x_bf, ((0, Bp - B), (0, 0)))

    grid = (Bp // bt,)

    # ---- VMEM budget (explicit, so v7x's 64 MiB physical / 32 MiB scoped is safe) ----
    vmem_bytes = (
        2 * bt * in_dim * 2                       # x tiles, bf16, double-buffered
        + 2 * bt * n_pad * 4                      # out tiles, f32, double-buffered
        + 2 * 2 * (in_dim * h1 + h1 * h2 + h2 * n_pad)  # bf16 weights (grid-invariant)
        + 2 * 4 * (3 * 8 * 128)                   # padded f32 bias tiles
        + 2 * bt * max(h1, h2) * 4                # intermediate activation scratch
    )
    vmem_limit = min(max(vmem_bytes + (8 << 20), 16 << 20), 32 << 20)

    out = pl.pallas_call(
        _mlp_kernel,
        out_shape=jax.ShapeDtypeStruct((Bp, n_pad), jnp.float32),
        grid=grid,
        in_specs=[
            pl.BlockSpec((bt, in_dim), lambda i: (i, 0)),   # x tile (streams over batch)
            pl.BlockSpec((in_dim, h1), lambda i: (0, 0)),   # w1 (grid-invariant, resident)
            pl.BlockSpec((1, h1), lambda i: (0, 0)),        # b1
            pl.BlockSpec((h1, h2), lambda i: (0, 0)),       # w2
            pl.BlockSpec((1, h2), lambda i: (0, 0)),        # b2
            pl.BlockSpec((h2, n_pad), lambda i: (0, 0)),    # w3 (lane-padded)
            pl.BlockSpec((1, n_pad), lambda i: (0, 0)),     # b3 (lane-padded)
        ],
        out_specs=pl.BlockSpec((bt, n_pad), lambda i: (i, 0)),
        compiler_params=pltpu.CompilerParams(
            dimension_semantics=("parallel",),   # batch axis shards across v7x's 2 TCs
            vmem_limit_bytes=vmem_limit,
        ),
    )(x_bf, w1_bf, b1, w2_bf, b2, w3_bf, b3)

    # Strip batch padding and output-lane padding (padded rows/cols never escape).
    return out[:B, :out_dim]


def init_mlp_params(key, in_dim, dims, out_dim):
    """Deterministic synthetic init mirroring the torch module's layer shapes.

    Torch Linear(in, out) has weight (out, in), bias (out,). We store the
    transposed weight (in, out) so the kernel does x @ W + b.
    """
    sizes = [in_dim] + list(dims) + [out_dim]
    params = {}
    for li in range(len(sizes) - 1):
        fi, fo = sizes[li], sizes[li + 1]
        key, kw, kb = jax.random.split(key, 3)
        bound = 1.0 / jnp.sqrt(fi)
        w = jax.random.uniform(kw, (fi, fo), jnp.float32, -bound, bound)
        b = jax.random.uniform(kb, (1, fo), jnp.float32, -bound, bound)
        params[f"w{li + 1}"] = w
        params[f"b{li + 1}"] = b
    return params


def mlp_reference_bf16(x, params):
    """Pure-JAX reference matching the kernel's precision scheme
    (bf16 matmul inputs, f32 accumulation, f32 bias/ReLU)."""
    bf = jnp.bfloat16
    h = jnp.dot(x.astype(bf), params["w1"].astype(bf),
                preferred_element_type=jnp.float32) + params["b1"]
    h = jnp.maximum(h, 0.0)
    h = jnp.dot(h.astype(bf), params["w2"].astype(bf),
                preferred_element_type=jnp.float32) + params["b2"]
    h = jnp.maximum(h, 0.0)
    return jnp.dot(h.astype(bf), params["w3"].astype(bf),
                   preferred_element_type=jnp.float32) + params["b3"]


def mlp_reference_f32(x, params):
    # Full-precision reference (sanity check only; kernel uses bf16 MXU inputs).
    h = jnp.maximum(x @ params["w1"] + params["b1"], 0.0)
    h = jnp.maximum(h @ params["w2"] + params["b2"], 0.0)
    return h @ params["w3"] + params["b3"]


if __name__ == "__main__":
    key = jax.random.PRNGKey(0)
    k_x, k_p = jax.random.split(key)

    batch, in_dim, out_dim = 8, 32, 16
    dims = [64, 64]  # MLP default: two hidden ReLU layers of 64

    x = jax.random.normal(k_x, (batch, in_dim), jnp.float32)
    params = init_mlp_params(k_p, in_dim, dims, out_dim)

    y = mlp_forward(x, params)
    y = jax.block_until_ready(y)

    assert y.shape == (batch, out_dim), y.shape

    # Precision-matched reference (tight tolerance).
    y_ref = mlp_reference_bf16(x, params)
    assert jnp.allclose(y, y_ref, atol=1e-3, rtol=1e-3), "mismatch vs bf16-matched reference"

    # Full-f32 reference (loose tolerance: bf16 matmul inputs, f32 accumulation).
    y_f32 = mlp_reference_f32(x, params)
    assert jnp.allclose(y, y_f32, atol=3e-2, rtol=3e-2), "mismatch vs f32 reference"

    print("KERNEL_OK")
</pallas_src>

<mosaic_0001>
module attributes {stable_mosaic.version = 11 : i64} {
  func.func @_mlp_kernel(%arg0: i32, %arg1: memref<8x32xbf16, #tpu.memory_space<vmem>>, %arg2: memref<32x64xbf16, #tpu.memory_space<vmem>>, %arg3: memref<1x64xf32, #tpu.memory_space<vmem>>, %arg4: memref<64x64xbf16, #tpu.memory_space<vmem>>, %arg5: memref<1x64xf32, #tpu.memory_space<vmem>>, %arg6: memref<64x128xbf16, #tpu.memory_space<vmem>>, %arg7: memref<1x128xf32, #tpu.memory_space<vmem>>, %arg8: memref<8x128xf32, #tpu.memory_space<vmem>>) attributes {dimension_semantics = [#tpu.dimension_semantics<parallel>], iteration_bounds = array<i64: 1>, scalar_prefetch = 0 : i64, scratch_operands = 0 : i64, tpu.core_type = #tpu.core_type<tc>, window_params = [{transform_indices = @transform_0, window_bounds = array<i64: 8, 32>}, {pipeline_mode = #tpu.pipeline_mode<synchronous>, transform_indices = @transform_1, window_bounds = array<i64: 32, 64>}, {pipeline_mode = #tpu.pipeline_mode<synchronous>, transform_indices = @transform_2, window_bounds = array<i64: 1, 64>}, {pipeline_mode = #tpu.pipeline_mode<synchronous>, transform_indices = @transform_3, window_bounds = array<i64: 64, 64>}, {pipeline_mode = #tpu.pipeline_mode<synchronous>, transform_indices = @transform_4, window_bounds = array<i64: 1, 64>}, {pipeline_mode = #tpu.pipeline_mode<synchronous>, transform_indices = @transform_5, window_bounds = array<i64: 64, 128>}, {pipeline_mode = #tpu.pipeline_mode<synchronous>, transform_indices = @transform_6, window_bounds = array<i64: 1, 128>}, {transform_indices = @transform_7, window_bounds = array<i64: 8, 128>}]} {
    %c0 = arith.constant 0 : index
    %c0_0 = arith.constant 0 : index
    %0 = vector.load %arg1[%c0, %c0_0] : memref<8x32xbf16, #tpu.memory_space<vmem>>, vector<8x32xbf16>
    %c0_1 = arith.constant 0 : index
    %c0_2 = arith.constant 0 : index
    %1 = vector.load %arg2[%c0_1, %c0_2] : memref<32x64xbf16, #tpu.memory_space<vmem>>, vector<32x64xbf16>
    %cst = arith.constant dense<0.000000e+00> : vector<8x64xf32>
    %2 = tpu.matmul %0, %1, %cst {dimension_numbers = #tpu.dot_dimension_numbers<[1], [0], [0], [1], [0, 0, 1, 1], [], []>} : vector<8x32xbf16>, vector<32x64xbf16>, vector<8x64xf32> -> vector<8x64xf32>
    %c0_3 = arith.constant 0 : index
    %c0_4 = arith.constant 0 : index
    %3 = vector.load %arg3[%c0_3, %c0_4] : memref<1x64xf32, #tpu.memory_space<vmem>>, vector<1x64xf32>
    %4 = vector.broadcast %3 : vector<1x64xf32> to vector<8x64xf32>
    %5 = arith.addf %2, %4 : vector<8x64xf32>
    %cst_5 = arith.constant 0.000000e+00 : f32
    %6 = vector.broadcast %cst_5 : f32 to vector<8x64xf32>
    %7 = arith.maximumf %5, %6 : vector<8x64xf32>
    %8 = arith.truncf %7 : vector<8x64xf32> to vector<8x64xbf16>
    %c0_6 = arith.constant 0 : index
    %c0_7 = arith.constant 0 : index
    %9 = vector.load %arg4[%c0_6, %c0_7] : memref<64x64xbf16, #tpu.memory_space<vmem>>, vector<64x64xbf16>
    %cst_8 = arith.constant dense<0.000000e+00> : vector<8x64xf32>
    %10 = tpu.matmul %8, %9, %cst_8 {dimension_numbers = #tpu.dot_dimension_numbers<[1], [0], [0], [1], [0, 0, 1, 1], [], []>} : vector<8x64xbf16>, vector<64x64xbf16>, vector<8x64xf32> -> vector<8x64xf32>
    %c0_9 = arith.constant 0 : index
    %c0_10 = arith.constant 0 : index
    %11 = vector.load %arg5[%c0_9, %c0_10] : memref<1x64xf32, #tpu.memory_space<vmem>>, vector<1x64xf32>
    %12 = vector.broadcast %11 : vector<1x64xf32> to vector<8x64xf32>
    %13 = arith.addf %10, %12 : vector<8x64xf32>
    %cst_11 = arith.constant 0.000000e+00 : f32
    %14 = vector.broadcast %cst_11 : f32 to vector<8x64xf32>
    %15 = arith.maximumf %13, %14 : vector<8x64xf32>
    %16 = arith.truncf %15 : vector<8x64xf32> to vector<8x64xbf16>
    %c0_12 = arith.constant 0 : index
    %c0_13 = arith.constant 0 : index
    %17 = vector.load %arg6[%c0_12, %c0_13] : memref<64x128xbf16, #tpu.memory_space<vmem>>, vector<64x128xbf16>
    %cst_14 = arith.constant dense<0.000000e+00> : vector<8x128xf32>
    %18 = tpu.matmul %16, %17, %cst_14 {dimension_numbers = #tpu.dot_dimension_numbers<[1], [0], [0], [1], [0, 0, 1, 1], [], []>} : vector<8x64xbf16>, vector<64x128xbf16>, vector<8x128xf32> -> vector<8x128xf32>
    %c0_15 = arith.constant 0 : index
    %c0_16 = arith.constant 0 : index
    %19 = vector.load %arg7[%c0_15, %c0_16] : memref<1x128xf32, #tpu.memory_space<vmem>>, vector<1x128xf32>
    %20 = vector.broadcast %19 : vector<1x128xf32> to vector<8x128xf32>
    %21 = arith.addf %18, %20 : vector<8x128xf32>
    %c0_17 = arith.constant 0 : index
    %c0_18 = arith.constant 0 : index
    %22 = vector.load %arg8[%c0_17, %c0_18] : memref<8x128xf32, #tpu.memory_space<vmem>>, vector<8x128xf32>
    tpu.vector_store %arg8[%c0_17, %c0_18], %21 {strides = array<i32>} : memref<8x128xf32, #tpu.memory_space<vmem>>, vector<8x128xf32>,
    return
  }
  func.func @transform_0(%arg0: i32) -> (i32, i32) {
    %c0_i32 = arith.constant 0 : i32
    %c0_i32_0 = arith.constant 0 : i32
    return %arg0, %c0_i32 : i32, i32
  }
  func.func @transform_1(%arg0: i32) -> (i32, i32) {
    %c0_i32 = arith.constant 0 : i32
    %c0_i32_0 = arith.constant 0 : i32
    %c0_i32_1 = arith.constant 0 : i32
    return %c0_i32, %c0_i32_0 : i32, i32
  }
  func.func @transform_2(%arg0: i32) -> (i32, i32) {
    %c0_i32 = arith.constant 0 : i32
    %c0_i32_0 = arith.constant 0 : i32
    %c0_i32_1 = arith.constant 0 : i32
    return %c0_i32, %c0_i32_0 : i32, i32
  }
  func.func @transform_3(%arg0: i32) -> (i32, i32) {
    %c0_i32 = arith.constant 0 : i32
    %c0_i32_0 = arith.constant 0 : i32
    %c0_i32_1 = arith.constant 0 : i32
    return %c0_i32, %c0_i32_0 : i32, i32
  }
  func.func @transform_4(%arg0: i32) -> (i32, i32) {
    %c0_i32 = arith.constant 0 : i32
    %c0_i32_0 = arith.constant 0 : i32
    %c0_i32_1 = arith.constant 0 : i32
    return %c0_i32, %c0_i32_0 : i32, i32
  }
  func.func @transform_5(%arg0: i32) -> (i32, i32) {
    %c0_i32 = arith.constant 0 : i32
    %c0_i32_0 = arith.constant 0 : i32
    %c0_i32_1 = arith.constant 0 : i32
    return %c0_i32, %c0_i32_0 : i32, i32
  }
  func.func @transform_6(%arg0: i32) -> (i32, i32) {
    %c0_i32 = arith.constant 0 : i32
    %c0_i32_0 = arith.constant 0 : i32
    %c0_i32_1 = arith.constant 0 : i32
    return %c0_i32, %c0_i32_0 : i32, i32
  }
  func.func @transform_7(%arg0: i32) -> (i32, i32) {
    %c0_i32 = arith.constant 0 : i32
    %c0_i32_0 = arith.constant 0 : i32
    return %arg0, %c0_i32 : i32, i32
  }
}

</mosaic_0001>

<bundles_post_ra>
// kernel: mlp_forward.1
= control target key start
LH: loop header
LB: loop body
LE: loop exit
PB: predicated region body
PF: predicated region fallthrough
CT: control target
= control target key end

     0   :  { %v378_v1 = vmov 0.0   ;;  %vm379_vm0 = vmmov 0   ;;  %vm52_vm1 = vcmask 261120   ;;  %s480_s0 = inlined_call_operand.vmem [shape: bf16[8,32], index: 0, kind: input, shape index: {}]   ;;  %s481_s1 = inlined_call_operand.vmem [shape: bf16[32,64], index: 1, kind: input, shape index: {}]   ;;  %s482_s2 = inlined_call_operand.vmem [shape: f32[1,64], index: 2, kind: input, shape index: {}]   ;;  %s483_s3 = inlined_call_operand.vmem [shape: bf16[64,64], index: 3, kind: input, shape index: {}]   ;;  %s484_s4 = inlined_call_operand.vmem [shape: f32[1,64], index: 4, kind: input, shape index: {}]   ;;  %s485_s5 = inlined_call_operand.vmem [shape: bf16[64,128], index: 5, kind: input, shape index: {}]   ;;  %s486_s6 = inlined_call_operand.vmem [shape: f32[1,128], index: 6, kind: input, shape index: {}]   ;;  %s487_s7 = inlined_call_operand.hbm [shape: f32[8,128], index: 7, kind: output, shape index: {}]  }
   0x1   :  { %v344_v0 = vld [vmem:[%s481_s1] sm:$0xff]   ;;  %309 = vmatprep.subr.bf16.mxu0 %v378_v1  ;;  %317 = vmatprep.subr.bf16.mxu1 %v378_v1  ;;  %v345_v2 = vld [vmem:[%s481_s1 + $0x8] sm:$0xff]  }
   0x2   :  { %310 = vmatpush3.bf16.msra.mxu0 %v344_v0  ;;  %313 = vmatprep.mubr.msk.bf16.mxu0 %vm379_vm0, %v378_v1  ;;  %v346_v3 = vld [vmem:[%s483_s3] sm:$0xff]   ;;  %v347_v5 = vld [vmem:[%s483_s3 + $0x8] sm:$0xff]  }
   0x3   :  { %311 = vmatprep.subr.bf16.mxu0 %v378_v1  ;;  %325 = vmatprep.mubr.msk.bf16.mxu1 %vm379_vm0, %v378_v1  ;;  %v28_v4 = vld [vmem:[%s480_s0] sm:$0xf] }
   0x4   :  { %318 = vmatpush3.bf16.msra.mxu1 %v346_v3 }
   0x5   :  { %319 = vmatprep.subr.bf16.mxu1 %v378_v1 }
   0x6   :  { %312 = vmatpush3.bf16.msra.mxu0 %v345_v2 }
   0x7   :  { %329 = vmatprep.subr.bf16.mxu0 %v378_v1 }
   0x8   :  { %320 = vmatpush3.bf16.msra.mxu1 %v347_v5 }
   0x9   :  { %12 = vsyncpa [#allocation3], 0  ;;  %314 = vmatmul.mubr.msk.bf16.vlgmr.msra.gmra.mrb[0].mxu0 %vm52_vm1, %v28_v4  ;;  %321 = vmatprep.subr.bf16.mxu1 %v378_v1  ;;  %v348_v6 = vld [vmem:[%s483_s3 + $0x10] sm:$0xff]   ;;  %v349_v7 = vld [vmem:[%s483_s3 + $0x18] sm:$0xff]   ;;  %vm137_vm2 = vcmask 523264   ;;  %s380_s25 = smov [#allocation2]  }
   0xa   :  { %337 = vmatprep.mubr.msk.bf16.mxu0 %vm379_vm0, %v378_v1  ;;  %v350_v8 = vld [vmem:[%s485_s5] sm:$0xff]   ;;  %v351_v9 = vld [vmem:[%s485_s5 + $0x8] sm:$0xff]   ;;  %v352_v18 = vld [vmem:[%s485_s5 + $0x10] sm:$0xff]  }
   0xb   :  { %330 = vmatpush3.bf16.msra.mxu0 %v350_v8  ;;  %v280_v10 = vld [vmem:[%s482_s2] ss:$0 sm:$0xff]  ;;  %v353_v19 = vld [vmem:[%s485_s5 + $0x18] sm:$0xff]   ;;  %s272_s5 = sshll.u32 %s380_s25, 4  ;;  %s273_s5 = int_to_ptr.vmem [resolvable:$true] %s272_s5 }
   0xc   :  { %322 = vmatpush3.bf16.msra.mxu1 %v348_v6  ;;  %331 = vmatprep.subr.bf16.mxu0 %v378_v1  ;;  %v284_v20 = vld [vmem:[%s484_s4] ss:$0 sm:$0xff]  ;;  %s354_s4 = scalar_lea.vmem %s273_s5, 128  ;;  %p359_p1 = scmp.lt.s32.totalorder %s273_s5, %s273_s5 }
   0xd   :  { %323 = vmatprep.subr.bf16.mxu1 %v378_v1  ;;  %v290_v28 = vld [vmem:[%s486_s6] ss:$0 sm:$0xff]  ;;  %p355_p0 = scmp.ne.s32.totalorder %s273_s5, %s354_s4  ;;  %p360_p2 = scmp.lt.s32.totalorder %s354_s4, %s354_s4 }
   0xf   :  { %332 = vmatpush3.bf16.msra.mxu0 %v351_v9  ;;  %p361_p3 = por %p360_p2, %p359_p1 }
  0x10   :  { %324 = vmatpush3.bf16.msra.mxu1 %v349_v7  ;;  %333 = vmatprep.subr.bf16.mxu0 %v378_v1 }
  0x11   :  { %p362_p4 = pnand %p361_p3, %p355_p0 }
  0x13   :  { %334 = vmatpush3.bf16.msra.mxu0 %v352_v18 }
  0x14   :  { %335 = vmatprep.subr.bf16.mxu0 %v378_v1 }
  0x17   :  { %336 = vmatpush3.bf16.msra.mxu0 %v353_v19 }
  0xdc   :  { %v90_v11 = vpop.f32.mrb[0].mxu0 }
  0xdd   :  { %v91_v12 = vadd.f32 %v280_v10, %v90_v11  ;;  %v315_v13 = vpop.f32.mrb[1].mxu0 }
  0xde   :  { %v93_v14 = vpop.f32.mrb[2].mxu0 }
  0xdf   :  { %v96_v15 = vmax.f32 %v91_v12, 0.0  ;;  %v316_v16 = vpop.f32.mrb[3].mxu0 }
  0xe1   :  { %v97_v17 = vpack.c.bf16 %v96_v15, %v96_v15 }
  0xe3   :  { %326 = vmatmul.mubr.msk.bf16.vlgmr.msra.gmra.mrb[0].mxu1 %vm137_vm2, %v97_v17 }
 0x1b6   :  { %v175_v21 = vpop.f32.mrb[0].mxu1 }
 0x1b7   :  { %v176_v22 = vadd.f32 %v284_v20, %v175_v21  ;;  %v327_v23 = vpop.f32.mrb[1].mxu1 }
 0x1b8   :  { %v178_v24 = vpop.f32.mrb[2].mxu1 }
 0x1b9   :  { %v181_v25 = vmax.f32 %v176_v22, 0.0  ;;  %v328_v26 = vpop.f32.mrb[3].mxu1 }
 0x1bb   :  { %v182_v27 = vpack.c.bf16 %v181_v25, %v181_v25 }
 0x1bd   :  { %338 = vmatmul.mubr.msk.bf16.vlgmr.msra.gmra.mrb[4].mxu0 %vm137_vm2, %v182_v27 }
 0x290   :  { %v259_v29 = vpop.f32.mrb[4].mxu0 }
 0x291   :  { %v260_v30 = vadd.f32 %v290_v28, %v259_v29  ;;  %v339_v31 = vpop.f32.mrb[5].mxu0 }
 0x292   :  { %v262_v32 = vpop.f32.mrb[6].mxu0 }
 0x293   :  { %265 = vst [vmem:[#allocation2] sm:$0xff] %v260_v30  ;;  %v340_v33 = vpop.f32.mrb[7].mxu0 }
 0x294   :  { %365 = shalt.err (!%p362_p4)
}
 0x295   :  { %s366_s6 = scalar_lea.hbm %s487_s7, 128 }
 0x296   :  { %p367_p5 = scmp.ne.s32.totalorder %s487_s7, %s366_s6  ;;  %p370_p6 = scmp.lt.u32.totalorder %s366_s6, %s487_s7 }
 0x298   :  { %p372_p7 = pnand %p370_p6, %p367_p5 }
 0x29a   :  { %375 = shalt.err (!%p372_p7)
}
 0x29b   :  { %275 = dma.vmem_to_hbm [thread:$0]  %s273_s5, 128, %s487_s7, [#allocation3]  }
 0x29c   :  { %376 = dma.done.wait [#allocation3], 128  }
 0x29d   :  { %377 = vsyncadd [#allocation3], 4294967168 }
 0x29e   :  { %279 = vsyncpa [#allocation3], 1 }

</bundles_post_ra>
